<compile_context>
chip_gen: v7x
topology: tpu7x:2x2x1
jax: 0.10.0
libtpu: 0.0.40
codegen_flags: <defaults>
</compile_context>

<pallas_src>
import functools

import jax
import jax.numpy as jnp
from jax import lax
from jax.experimental import pallas as pl
from jax.experimental.pallas import tpu as pltpu

BN_EPS = 1e-5
LANE = 128
SUBLANE = 8


def _round_up(n, m):
    return ((n + m - 1) // m) * m


def _pad_axis(a, axis, target):
    pad = target - a.shape[axis]
    if pad <= 0:
        return a
    widths = [(0, 0)] * a.ndim
    widths[axis] = (0, pad)
    return jnp.pad(a, widths)


def mlp_kernel(x_ref, w1_ref, b1_ref, gamma_ref, beta_ref, w2_ref, b2_ref,
               o_ref, acc_ref):
    k = pl.program_id(0)

    x = x_ref[...]                                   # [B, In_p]
    w1 = w1_ref[...]                                 # [In_p, TH]  (pre-transposed tile)

    # fc1 tile: [B, In_p] @ [In_p, TH] + b1
    h = jnp.dot(x, w1, preferred_element_type=jnp.float32) + b1_ref[...]

    # BatchNorm1d (training mode: batch stats, biased variance), folded into a
    # single per-feature scale/shift.  Padded lanes have gamma == 0, so they stay 0.
    mean = jnp.mean(h, axis=0, keepdims=True)                        # [1, TH]
    var = jnp.mean((h - mean) * (h - mean), axis=0, keepdims=True)   # [1, TH]
    scale = gamma_ref[...] * lax.rsqrt(var + BN_EPS)                 # [1, TH]
    shift = beta_ref[...] - mean * scale                             # [1, TH]

    # BN + ReLU: one mul + one add per element, then max.
    h = jnp.maximum(h * scale + shift, 0.0)

    # fc2 partial product over this H tile, accumulated in f32 VMEM scratch.
    @pl.when(k == 0)
    def _():
        acc_ref[...] = jnp.zeros_like(acc_ref)

    acc_ref[...] += jnp.dot(h, w2_ref[...], preferred_element_type=jnp.float32)

    @pl.when(k == pl.num_programs(0) - 1)
    def _():
        o_ref[...] = acc_ref[...] + b2_ref[...]


@functools.partial(jax.jit, static_argnames=())
def mlp_forward(x, w1, b1, w2, b2, gamma, beta):
    """x: [B, In]; w1: [H, In]; b1: [H]; w2: [O, H]; b2: [O]; gamma/beta: [H]."""
    B, In = x.shape
    H = w1.shape[0]
    O = w2.shape[0]

    In_p = _round_up(In, SUBLANE)
    H_p = _round_up(H, LANE)
    O_p = _round_up(O, LANE)          # lane-dense output slab (unmasked stores)
    TH = min(H_p, 512)                # H tile (128 here); re-derive for huge H / v7x VMEM
    n_h = H_p // TH

    # Wrapper-side layout work (free under XLA): transpose + zero-pad.
    xp = _pad_axis(x, 1, In_p)                                        # [B, In_p]
    w1t = _pad_axis(_pad_axis(w1.T, 0, In_p), 1, H_p)                 # [In_p, H_p]
    b1p = _pad_axis(b1.reshape(1, H), 1, H_p)                         # [1, H_p]
    gp = _pad_axis(gamma.reshape(1, H), 1, H_p)                       # [1, H_p] (zeros pad)
    bp = _pad_axis(beta.reshape(1, H), 1, H_p)                        # [1, H_p]
    w2t = _pad_axis(_pad_axis(w2.T, 0, H_p), 1, O_p)                  # [H_p, O_p]
    b2p = _pad_axis(b2.reshape(1, O), 1, O_p)                         # [1, O_p]

    # NOTE: batch is kept whole per grid step so BN batch statistics are exact.
    # TODO(synk): for v7x dual-TC, a "parallel" axis over padded output features (or a
    # two-pass BN) would be needed; at O_p = 128 there is a single output tile.
    out = pl.pallas_call(
        mlp_kernel,
        out_shape=jax.ShapeDtypeStruct((B, O_p), jnp.float32),
        grid_spec=pltpu.PrefetchScalarGridSpec(
            num_scalar_prefetch=0,
            grid=(n_h,),
            in_specs=[
                pl.BlockSpec((B, In_p), lambda k: (0, 0)),    # x (resident)
                pl.BlockSpec((In_p, TH), lambda k: (0, k)),   # w1^T tile
                pl.BlockSpec((1, TH), lambda k: (0, k)),      # b1 tile
                pl.BlockSpec((1, TH), lambda k: (0, k)),      # gamma tile
                pl.BlockSpec((1, TH), lambda k: (0, k)),      # beta tile
                pl.BlockSpec((TH, O_p), lambda k: (k, 0)),    # w2^T tile
                pl.BlockSpec((1, O_p), lambda k: (0, 0)),     # b2 (resident)
            ],
            out_specs=pl.BlockSpec((B, O_p), lambda k: (0, 0)),
            scratch_shapes=[pltpu.VMEM((B, O_p), jnp.float32)],
        ),
        compiler_params=pltpu.CompilerParams(
            dimension_semantics=("arbitrary",),   # H axis is a reduction for fc2
        ),
    )(xp, w1t, b1p, gp, bp, w2t, b2p)

    return out[:, :O]


def kaiming_uniform(key, shape, fan_in):
    # PyTorch init.kaiming_uniform_ with nonlinearity='relu', mode='fan_in':
    # gain = sqrt(2), bound = gain * sqrt(3 / fan_in)
    bound = jnp.sqrt(2.0) * jnp.sqrt(3.0 / fan_in)
    return jax.random.uniform(key, shape, jnp.float32, -bound, bound)


def linear_bias(key, shape, fan_in):
    # PyTorch nn.Linear default bias init: U(-1/sqrt(fan_in), 1/sqrt(fan_in))
    bound = 1.0 / jnp.sqrt(fan_in)
    return jax.random.uniform(key, shape, jnp.float32, -bound, bound)


if __name__ == "__main__":
    input_size = 16
    hidden_size = 20
    output_size = 1
    batch = 8

    key = jax.random.PRNGKey(0)
    kx, kw1, kb1, kw2, kb2 = jax.random.split(key, 5)

    x = jax.random.normal(kx, (batch, input_size), jnp.float32)

    w1 = kaiming_uniform(kw1, (hidden_size, input_size), fan_in=input_size)
    b1 = linear_bias(kb1, (hidden_size,), fan_in=input_size)
    w2 = kaiming_uniform(kw2, (output_size, hidden_size), fan_in=hidden_size)
    b2 = linear_bias(kb2, (output_size,), fan_in=hidden_size)
    gamma = jnp.ones((hidden_size,), jnp.float32)    # BatchNorm1d weight init
    beta = jnp.zeros((hidden_size,), jnp.float32)    # BatchNorm1d bias init

    out = mlp_forward(x, w1, b1, w2, b2, gamma, beta)
    jax.block_until_ready(out)

    # Pure-JAX reference (same semantics as the PyTorch forward in training mode).
    h_ref = x @ w1.T + b1[None, :]
    m = h_ref.mean(0, keepdims=True)
    v = ((h_ref - m) ** 2).mean(0, keepdims=True)
    h_ref = (h_ref - m) / jnp.sqrt(v + BN_EPS) * gamma[None, :] + beta[None, :]
    h_ref = jnp.maximum(h_ref, 0.0)
    ref = h_ref @ w2.T + b2[None, :]

    assert out.shape == (batch, output_size)
    assert jnp.allclose(out, ref, atol=1e-5, rtol=1e-5)

    print("KERNEL_OK")
</pallas_src>

<mosaic_0001>
module attributes {stable_mosaic.version = 11 : i64} {
  func.func @mlp_kernel(%arg0: i32, %arg1: memref<8x16xf32, #tpu.memory_space<vmem>>, %arg2: memref<16x128xf32, #tpu.memory_space<vmem>>, %arg3: memref<1x128xf32, #tpu.memory_space<vmem>>, %arg4: memref<1x128xf32, #tpu.memory_space<vmem>>, %arg5: memref<1x128xf32, #tpu.memory_space<vmem>>, %arg6: memref<128x128xf32, #tpu.memory_space<vmem>>, %arg7: memref<1x128xf32, #tpu.memory_space<vmem>>, %arg8: memref<8x128xf32, #tpu.memory_space<vmem>>, %arg9: memref<8x128xf32, #tpu.memory_space<vmem>>) attributes {dimension_semantics = [#tpu.dimension_semantics<arbitrary>], iteration_bounds = array<i64: 1>, scalar_prefetch = 0 : i64, scratch_operands = 1 : i64, tpu.core_type = #tpu.core_type<tc>, window_params = [{pipeline_mode = #tpu.pipeline_mode<synchronous>, transform_indices = @transform_0, window_bounds = array<i64: 8, 16>}, {transform_indices = @transform_1, window_bounds = array<i64: 16, 128>}, {transform_indices = @transform_2, window_bounds = array<i64: 1, 128>}, {transform_indices = @transform_3, window_bounds = array<i64: 1, 128>}, {transform_indices = @transform_4, window_bounds = array<i64: 1, 128>}, {transform_indices = @transform_5, window_bounds = array<i64: 128, 128>}, {pipeline_mode = #tpu.pipeline_mode<synchronous>, transform_indices = @transform_6, window_bounds = array<i64: 1, 128>}, {pipeline_mode = #tpu.pipeline_mode<synchronous>, transform_indices = @transform_7, window_bounds = array<i64: 8, 128>}]} {
    %c0 = arith.constant 0 : index
    %c0_0 = arith.constant 0 : index
    %0 = vector.load %arg1[%c0, %c0_0] : memref<8x16xf32, #tpu.memory_space<vmem>>, vector<8x16xf32>
    %c0_1 = arith.constant 0 : index
    %c0_2 = arith.constant 0 : index
    %1 = vector.load %arg2[%c0_1, %c0_2] : memref<16x128xf32, #tpu.memory_space<vmem>>, vector<16x128xf32>
    %cst = arith.constant dense<0.000000e+00> : vector<8x128xf32>
    %2 = tpu.matmul %0, %1, %cst {dimension_numbers = #tpu.dot_dimension_numbers<[1], [0], [0], [1], [0, 0, 1, 1], [], []>} : vector<8x16xf32>, vector<16x128xf32>, vector<8x128xf32> -> vector<8x128xf32>
    %c0_3 = arith.constant 0 : index
    %c0_4 = arith.constant 0 : index
    %3 = vector.load %arg3[%c0_3, %c0_4] : memref<1x128xf32, #tpu.memory_space<vmem>>, vector<1x128xf32>
    %4 = vector.broadcast %3 : vector<1x128xf32> to vector<8x128xf32>
    %5 = arith.addf %2, %4 : vector<8x128xf32>
    %cst_5 = arith.constant dense<0.000000e+00> : vector<128xf32>
    %6 = vector.multi_reduction <add>, %5, %cst_5 [0] : vector<8x128xf32> to vector<128xf32>
    %7 = vector.shape_cast %6 : vector<128xf32> to vector<1x128xf32>
    %cst_6 = arith.constant 8.000000e+00 : f32
    %8 = vector.broadcast %cst_6 : f32 to vector<1x128xf32>
    %9 = arith.divf %7, %8 : vector<1x128xf32>
    %10 = vector.broadcast %9 : vector<1x128xf32> to vector<8x128xf32>
    %11 = arith.subf %5, %10 : vector<8x128xf32>
    %12 = vector.broadcast %9 : vector<1x128xf32> to vector<8x128xf32>
    %13 = arith.subf %5, %12 : vector<8x128xf32>
    %14 = arith.mulf %11, %13 : vector<8x128xf32>
    %cst_7 = arith.constant dense<0.000000e+00> : vector<128xf32>
    %15 = vector.multi_reduction <add>, %14, %cst_7 [0] : vector<8x128xf32> to vector<128xf32>
    %16 = vector.shape_cast %15 : vector<128xf32> to vector<1x128xf32>
    %cst_8 = arith.constant 8.000000e+00 : f32
    %17 = vector.broadcast %cst_8 : f32 to vector<1x128xf32>
    %18 = arith.divf %16, %17 : vector<1x128xf32>
    %c0_9 = arith.constant 0 : index
    %c0_10 = arith.constant 0 : index
    %19 = vector.load %arg4[%c0_9, %c0_10] : memref<1x128xf32, #tpu.memory_space<vmem>>, vector<1x128xf32>
    %cst_11 = arith.constant 9.99999974E-6 : f32
    %20 = vector.broadcast %cst_11 : f32 to vector<1x128xf32>
    %21 = arith.addf %18, %20 : vector<1x128xf32>
    %22 = math.rsqrt %21 : vector<1x128xf32>
    %23 = arith.mulf %19, %22 : vector<1x128xf32>
    %c0_12 = arith.constant 0 : index
    %c0_13 = arith.constant 0 : index
    %24 = vector.load %arg5[%c0_12, %c0_13] : memref<1x128xf32, #tpu.memory_space<vmem>>, vector<1x128xf32>
    %25 = arith.mulf %9, %23 : vector<1x128xf32>
    %26 = arith.subf %24, %25 : vector<1x128xf32>
    %27 = vector.broadcast %23 : vector<1x128xf32> to vector<8x128xf32>
    %28 = arith.mulf %5, %27 : vector<8x128xf32>
    %29 = vector.broadcast %26 : vector<1x128xf32> to vector<8x128xf32>
    %30 = arith.addf %28, %29 : vector<8x128xf32>
    %cst_14 = arith.constant 0.000000e+00 : f32
    %31 = vector.broadcast %cst_14 : f32 to vector<8x128xf32>
    %32 = arith.maximumf %30, %31 : vector<8x128xf32>
    %c0_i32 = arith.constant 0 : i32
    %33 = arith.cmpi eq, %arg0, %c0_i32 : i32
    %34 = arith.extui %33 : i1 to i32
    %c0_i32_15 = arith.constant 0 : i32
    %35 = arith.cmpi ne, %34, %c0_i32_15 : i32
    scf.if %35 {
      %cst_25 = arith.constant 0.000000e+00 : f32
      %44 = vector.broadcast %cst_25 : f32 to vector<8x128xf32>
      %c0_26 = arith.constant 0 : index
      %c0_27 = arith.constant 0 : index
      %45 = vector.load %arg9[%c0_26, %c0_27] : memref<8x128xf32, #tpu.memory_space<vmem>>, vector<8x128xf32>
      tpu.vector_store %arg9[%c0_26, %c0_27], %44 {strides = array<i32>} : memref<8x128xf32, #tpu.memory_space<vmem>>, vector<8x128xf32>,
    } else {
    }
    %c0_16 = arith.constant 0 : index
    %c0_17 = arith.constant 0 : index
    %36 = vector.load %arg9[%c0_16, %c0_17] : memref<8x128xf32, #tpu.memory_space<vmem>>, vector<8x128xf32>
    %c0_18 = arith.constant 0 : index
    %c0_19 = arith.constant 0 : index
    %37 = vector.load %arg6[%c0_18, %c0_19] : memref<128x128xf32, #tpu.memory_space<vmem>>, vector<128x128xf32>
    %cst_20 = arith.constant dense<0.000000e+00> : vector<8x128xf32>
    %38 = tpu.matmul %32, %37, %cst_20 {dimension_numbers = #tpu.dot_dimension_numbers<[1], [0], [0], [1], [0, 0, 1, 1], [], []>} : vector<8x128xf32>, vector<128x128xf32>, vector<8x128xf32> -> vector<8x128xf32>
    %39 = arith.addf %36, %38 : vector<8x128xf32>
    %c0_21 = arith.constant 0 : index
    %c0_22 = arith.constant 0 : index
    %40 = vector.load %arg9[%c0_21, %c0_22] : memref<8x128xf32, #tpu.memory_space<vmem>>, vector<8x128xf32>
    tpu.vector_store %arg9[%c0_21, %c0_22], %39 {strides = array<i32>} : memref<8x128xf32, #tpu.memory_space<vmem>>, vector<8x128xf32>,
    %c0_i32_23 = arith.constant 0 : i32
    %41 = arith.cmpi eq, %arg0, %c0_i32_23 : i32
    %42 = arith.extui %41 : i1 to i32
    %c0_i32_24 = arith.constant 0 : i32
    %43 = arith.cmpi ne, %42, %c0_i32_24 : i32
    scf.if %43 {
      %c0_25 = arith.constant 0 : index
      %c0_26 = arith.constant 0 : index
      %44 = vector.load %arg9[%c0_25, %c0_26] : memref<8x128xf32, #tpu.memory_space<vmem>>, vector<8x128xf32>
      %c0_27 = arith.constant 0 : index
      %c0_28 = arith.constant 0 : index
      %45 = vector.load %arg7[%c0_27, %c0_28] : memref<1x128xf32, #tpu.memory_space<vmem>>, vector<1x128xf32>
      %46 = vector.broadcast %45 : vector<1x128xf32> to vector<8x128xf32>
      %47 = arith.addf %44, %46 : vector<8x128xf32>
      %c0_29 = arith.constant 0 : index
      %c0_30 = arith.constant 0 : index
      %48 = vector.load %arg8[%c0_29, %c0_30] : memref<8x128xf32, #tpu.memory_space<vmem>>, vector<8x128xf32>
      tpu.vector_store %arg8[%c0_29, %c0_30], %47 {strides = array<i32>} : memref<8x128xf32, #tpu.memory_space<vmem>>, vector<8x128xf32>,
    } else {
    }
    return
  }
  func.func @transform_0(%arg0: i32) -> (i32, i32) {
    %c0_i32 = arith.constant 0 : i32
    %c0_i32_0 = arith.constant 0 : i32
    %c0_i32_1 = arith.constant 0 : i32
    return %c0_i32, %c0_i32_0 : i32, i32
  }
  func.func @transform_1(%arg0: i32) -> (i32, i32) {
    %c0_i32 = arith.constant 0 : i32
    %c0_i32_0 = arith.constant 0 : i32
    return %c0_i32, %arg0 : i32, i32
  }
  func.func @transform_2(%arg0: i32) -> (i32, i32) {
    %c0_i32 = arith.constant 0 : i32
    %c0_i32_0 = arith.constant 0 : i32
    return %c0_i32, %arg0 : i32, i32
  }
  func.func @transform_3(%arg0: i32) -> (i32, i32) {
    %c0_i32 = arith.constant 0 : i32
    %c0_i32_0 = arith.constant 0 : i32
    return %c0_i32, %arg0 : i32, i32
  }
  func.func @transform_4(%arg0: i32) -> (i32, i32) {
    %c0_i32 = arith.constant 0 : i32
    %c0_i32_0 = arith.constant 0 : i32
    return %c0_i32, %arg0 : i32, i32
  }
  func.func @transform_5(%arg0: i32) -> (i32, i32) {
    %c0_i32 = arith.constant 0 : i32
    %c0_i32_0 = arith.constant 0 : i32
    return %arg0, %c0_i32 : i32, i32
  }
  func.func @transform_6(%arg0: i32) -> (i32, i32) {
    %c0_i32 = arith.constant 0 : i32
    %c0_i32_0 = arith.constant 0 : i32
    %c0_i32_1 = arith.constant 0 : i32
    return %c0_i32, %c0_i32_0 : i32, i32
  }
  func.func @transform_7(%arg0: i32) -> (i32, i32) {
    %c0_i32 = arith.constant 0 : i32
    %c0_i32_0 = arith.constant 0 : i32
    %c0_i32_1 = arith.constant 0 : i32
    return %c0_i32, %c0_i32_0 : i32, i32
  }
}

</mosaic_0001>

<bundles_post_ra>
// kernel: mlp_forward.1
= control target key start
LH: loop header
LB: loop body
LE: loop exit
PB: predicated region body
PF: predicated region fallthrough
CT: control target
= control target key end

     0   :  { %v357_v0 = vmov 0.0|0.0   ;;  %vm358_vm0 = vmmov 0   ;;  %v359_v3 = vmov 0.0   ;;  %vm36_vm1 = vcmask 130048   ;;  %s472_s1 = inlined_call_operand.vmem [shape: f32[16,128], index: 1, kind: input, shape index: {}]   ;;  %s473_s0 = inlined_call_operand.vmem [shape: f32[8,16], index: 0, kind: input, shape index: {}]   ;;  %s474_s5 = inlined_call_operand.vmem [shape: f32[128,128], index: 5, kind: input, shape index: {}]   ;;  %s475_s2 = inlined_call_operand.vmem [shape: f32[1,128], index: 2, kind: input, shape index: {}]   ;;  %s476_s3 = inlined_call_operand.vmem [shape: f32[1,128], index: 3, kind: input, shape index: {}]   ;;  %s477_s4 = inlined_call_operand.vmem [shape: f32[1,128], index: 4, kind: input, shape index: {}]   ;;  %s478_s6 = inlined_call_operand.vmem [shape: f32[1,128], index: 6, kind: input, shape index: {}]   ;;  %s479_s7 = inlined_call_operand.vmem [shape: f32[8,128], index: 7, kind: output, shape index: {}]  }
   0x1   :  { %325 = vmatprep.subr.bf16.mxu0 %v357_v0  ;;  %v27_v1 = vld [vmem:[%s472_s1] sm:$0xff]  ;;  %v28_v2 = vld [vmem:[%s472_s1 + $0x8] sm:$0xff]  ;;  %287 = vmatprep.mubr.msk.f32.mxu0 %vm358_vm0, %v359_v3  ;;  %v157_v9 = vld [vmem:[%s474_s5 + $0x10] sm:$0xff]  ;;  %v135_v51 = vlaneseq }
   0x2   :  { %v326_v4 = vpack.c.bf16 %v28_v2, %v27_v1  ;;  %328 = vmatprep.subr.bf16.mxu1 %v357_v0  ;;  %322 = vmatprep.mubr.msk.f32.mxu1 %vm358_vm0, %v359_v3  ;;  %v26_v5 = vld [vmem:[%s473_s0] sm:$0xff]  ;;  %v156_v7 = vld [vmem:[%s474_s5 + $0x8] sm:$0xff]  ;;  %v158_v10 = vld [vmem:[%s474_s5 + $0x18] sm:$0xff] }
   0x3   :  { %v155_v6 = vld [vmem:[%s474_s5] sm:$0xff]  ;;  %v332_v11 = vpack.c.bf16 %v158_v10, %v157_v9  ;;  %v160_v13 = vld [vmem:[%s474_s5 + $0x28] sm:$0xff]  ;;  %v161_v15 = vld [vmem:[%s474_s5 + $0x30] sm:$0xff]  ;;  %v136_v52 = vshrl.u32 %v135_v51, 7 }
   0x4   :  { %327 = vmatpush3.bf16.msra.mxu0 %v326_v4  ;;  %v329_v8 = vpack.c.bf16 %v156_v7, %v155_v6  ;;  %v159_v12 = vld [vmem:[%s474_s5 + $0x20] sm:$0xff]  ;;  %v162_v16 = vld [vmem:[%s474_s5 + $0x38] sm:$0xff]  ;;  %v164_v19 = vld [vmem:[%s474_s5 + $0x48] sm:$0xff] }
   0x5   :  { %v335_v14 = vpack.c.bf16 %v160_v13, %v159_v12  ;;  %v338_v17 = vpack.c.bf16 %v162_v16, %v161_v15  ;;  %v163_v18 = vld [vmem:[%s474_s5 + $0x40] sm:$0xff]  ;;  %v165_v21 = vld [vmem:[%s474_s5 + $0x50] sm:$0xff]  ;;  %v166_v22 = vld [vmem:[%s474_s5 + $0x58] sm:$0xff]  ;;  %v137_v54 = vsub.s32 0, %v136_v52 }
   0x6   :  { %330 = vmatpush3.bf16.msra.mxu1 %v329_v8  ;;  %v341_v20 = vpack.c.bf16 %v164_v19, %v163_v18  ;;  %v344_v23 = vpack.c.bf16 %v166_v22, %v165_v21  ;;  %v167_v24 = vld [vmem:[%s474_s5 + $0x60] sm:$0xff]  ;;  %v168_v25 = vld [vmem:[%s474_s5 + $0x68] sm:$0xff]  ;;  %v169_v27 = vld [vmem:[%s474_s5 + $0x70] sm:$0xff] }
   0x7   :  { %288 = vmatmul.mubr.msk.f32.vlgmr.msra.gmra.mrb[0].mxu0 %vm36_vm1, %v26_v5  ;;  %331 = vmatprep.subr.bf16.mxu1 %v357_v0  ;;  %v347_v26 = vpack.c.bf16 %v168_v25, %v167_v24  ;;  %v170_v28 = vld [vmem:[%s474_s5 + $0x78] sm:$0xff]  ;;  %v260_v30 = vld [vmem:[%s475_s2] ss:$0 sm:$0xff] }
   0x8   :  { %v350_v29 = vpack.c.bf16 %v170_v28, %v169_v27  ;;  %v127_v53 = vld [vmem:[%s476_s3] sm:$0x1] }
   0x9   :  { %v131_v57 = vld [vmem:[%s477_s4] sm:$0x1] }
   0xa   :  { %333 = vmatpush3.bf16.msra.mxu1 %v332_v11  ;;  %v262_v1 = vld [vmem:[%s478_s6] ss:$0 sm:$0xff] }
   0xb   :  { %334 = vmatprep.subr.bf16.mxu1 %v357_v0 }
   0xe   :  { %336 = vmatpush3.bf16.msra.mxu1 %v335_v14 }
   0xf   :  { %337 = vmatprep.subr.bf16.mxu1 %v357_v0 }
  0x12   :  { %339 = vmatpush3.bf16.msra.mxu1 %v338_v17 }
  0x13   :  { %340 = vmatprep.subr.bf16.mxu1 %v357_v0 }
  0x16   :  { %342 = vmatpush3.bf16.msra.mxu1 %v341_v20 }
  0x17   :  { %343 = vmatprep.subr.bf16.mxu1 %v357_v0 }
  0x1a   :  { %345 = vmatpush3.bf16.msra.mxu1 %v344_v23 }
  0x1b   :  { %346 = vmatprep.subr.bf16.mxu1 %v357_v0 }
  0x1e   :  { %348 = vmatpush3.bf16.msra.mxu1 %v347_v26 }
  0x1f   :  { %349 = vmatprep.subr.bf16.mxu1 %v357_v0 }
  0x22   :  { %351 = vmatpush3.bf16.msra.mxu1 %v350_v29 }
  0xda   :  { %v106_v31 = vpop.f32.mrb[0].mxu0 }
  0xdb   :  { %v107_v32 = vadd.f32 %v260_v30, %v106_v31  ;;  %v289_v33 = vpop.f32.mrb[1].mxu0 }
  0xdd   :  { %v110_v34 = vrot.slane %v107_v32, 4 }
  0xdf   :  { %v111_v35 = vadd.f32 %v110_v34, %v107_v32 }
  0xe1   :  { %v112_v36 = vrot.slane %v111_v35, 2 }
  0xe3   :  { %v113_v37 = vadd.f32 %v112_v36, %v111_v35 }
  0xe5   :  { %v114_v38 = vrot.slane %v113_v37, 1 }
  0xe7   :  { %v115_v39 = vadd.f32 %v114_v38, %v113_v37 }
  0xe9   :  { %v117_v40 = vmul.f32 0.125, %v115_v39 }
  0xeb   :  { %v118_v41 = vsub.f32 %v107_v32, %v117_v40 }
  0xed   :  { %v119_v42 = vmul.f32 %v118_v41, %v118_v41 }
  0xef   :  { %v120_v43 = vrot.slane %v119_v42, 4 }
  0xf1   :  { %v121_v44 = vadd.f32 %v120_v43, %v119_v42 }
  0xf3   :  { %v122_v45 = vrot.slane %v121_v44, 2 }
  0xf5   :  { %v123_v46 = vadd.f32 %v122_v45, %v121_v44 }
  0xf7   :  { %v124_v47 = vrot.slane %v123_v46, 1 }
  0xf9   :  { %v125_v48 = vadd.f32 %v124_v47, %v123_v46 }
  0xfb   :  { %v126_v49 = vmul.f32 0.125, %v125_v48 }
  0xfd   :  { %v128_v50 = vadd.f32 1e-05, %v126_v49 }
  0xff   :  { %355 = vrsqrt.f32 %v128_v50 }
 0x109   :  { %v356_v55 = vpop.eup %355 }
 0x10a   :  { %v130_v56 = vmul.f32 %v356_v55, %v127_v53 }
 0x10c   :  { %v132_v58 = vmul.f32 %v130_v56, %v117_v40  ;;  %v138_v59 = vrot.slane %v130_v56, %v137_v54 }
 0x10e   :  { %v133_v60 = vsub.f32 %v131_v57, %v132_v58  ;;  %v140_v61 = vmul.f32 %v138_v59, %v107_v32 }
 0x110   :  { %v145_v62 = vrot.slane %v133_v60, %v137_v54 }
 0x112   :  { %v147_v63 = vadd.f32 %v145_v62, %v140_v61 }
 0x114   :  { %v148_v0 = vmax.f32 %v147_v63, 0.0 }
 0x116   :  { %323 = vmatmul.mubr.f32.vlgmr.msra.gmra.mrb[0].mxu1 %v148_v0 }
 0x1e9   :  { %v237_v2 = vpop.f32.mrb[0].mxu1 }
 0x1ea   :  { %v254_v3 = vadd.f32 %v262_v1, %v237_v2  ;;  %v324_v4 = vpop.f32.mrb[1].mxu1 }
 0x1ec   :  { %255 = vst [vmem:[%s479_s7] sm:$0xff] %v254_v3 }

</bundles_post_ra>
